<compile_context>
chip_gen: v6e
topology: v6e:2x2x1
jax: 0.10.0
libtpu: 0.0.40
codegen_flags: <defaults>
</compile_context>

<pallas_src>
import functools

import jax
import jax.numpy as jnp
import numpy as np
from jax.experimental import pallas as pl
from jax.experimental.pallas import tpu as pltpu

LANES = 128
SUBLANES = 8


def _round_up(x, m):
    return -(-x // m) * m


def _masked_l1_kernel(pred_ref, tgt_ref, sum_ref, cnt_ref, *,
                      rows_total, block_rows, blocks_per_part, needs_mask):
    """Accumulate (8,128)-shaped partial sums of |pred-tgt| and of the mask."""
    p = pl.program_id(0)      # parts axis (parallel / core-parallel)
    i = pl.program_id(1)      # reduction axis (innermost)

    @pl.when(i == 0)
    def _():
        sum_ref[...] = jnp.zeros_like(sum_ref)
        cnt_ref[...] = jnp.zeros_like(cnt_ref)

    o = pred_ref[...].astype(jnp.float32)
    t = tgt_ref[...].astype(jnp.float32)
    not_nan = jnp.logical_not(jnp.isnan(t))
    absdiff = jnp.abs(o - t)

    def accumulate(valid):
        # Explicit selects (not |o-t| * mask) so NaN targets -- and any garbage
        # in the padded overhang of a boundary block -- are truly excluded.
        elem = jnp.where(valid, absdiff, jnp.float32(0.0))
        cnt = jnp.where(valid, jnp.float32(1.0), jnp.float32(0.0))
        r = block_rows  # static, a multiple of 8
        sum_ref[...] += jnp.sum(elem.reshape(r // SUBLANES, SUBLANES, LANES), axis=0)
        cnt_ref[...] += jnp.sum(cnt.reshape(r // SUBLANES, SUBLANES, LANES), axis=0)

    if not needs_mask:
        # Every block of the grid is fully in-bounds: no row masking at all.
        accumulate(not_nan)
    else:
        gb = p * blocks_per_part + i               # global block id (unclamped)
        is_full = (gb + 1) * block_rows <= rows_total

        @pl.when(is_full)
        def _():
            accumulate(not_nan)

        @pl.when(jnp.logical_not(is_full))
        def _():
            # Boundary (or clamped duplicate) block: mask rows past real data.
            rows_valid = rows_total - gb * block_rows   # <= 0 for a duplicate
            row_ids = jax.lax.broadcasted_iota(jnp.int32, (block_rows, LANES), 0)
            accumulate(jnp.logical_and(not_nan, row_ids < rows_valid))


def _masked_l1_partial_jnp(o, t):
    """Plain-jnp partial sums (small-input fast path / ragged tail epilogue)."""
    o = o.astype(jnp.float32)
    t = t.astype(jnp.float32)
    valid = jnp.logical_not(jnp.isnan(t))
    s = jnp.sum(jnp.where(valid, jnp.abs(o - t), jnp.float32(0.0)))
    c = jnp.sum(jnp.where(valid, jnp.float32(1.0), jnp.float32(0.0)))
    return s, c


def _parts_axis_semantics(num_parts):
    """CORE_PARALLEL on v7x (2 TensorCores/chip), plain 'parallel' elsewhere."""
    kind = ""
    try:
        kind = jax.devices()[0].device_kind.lower()
    except Exception:  # pragma: no cover - defensive
        pass
    if num_parts > 1 and "v7" in kind:
        return (pltpu.CORE_PARALLEL, pltpu.ARBITRARY)
    return ("parallel", "arbitrary")


def _masked_l1_pallas_partial(o2, t2, block_rows):
    """Partial (sum, count) over an (R,128)-shaped pair via the Pallas kernel."""
    rows = o2.shape[0]
    br = min(_round_up(block_rows, SUBLANES), _round_up(rows, SUBLANES))
    nblocks = pl.cdiv(rows, br)
    # Unconditional 2-way split whenever there is more than one block so both
    # v7x TensorCores stay busy; costs at most one duplicated (fully masked)
    # block of bandwidth.
    num_parts = 2 if nblocks >= 2 else 1
    blocks_per_part = pl.cdiv(nblocks, num_parts)
    total_blocks = num_parts * blocks_per_part
    needs_mask = (total_blocks * br != rows)

    if total_blocks > nblocks:
        # Clamp the duplicate block's index; its contribution is masked to 0.
        in_map = lambda p, i: (jnp.minimum(p * blocks_per_part + i, nblocks - 1), 0)
    else:
        in_map = lambda p, i: (p * blocks_per_part + i, 0)
    out_map = lambda p, i: (p, 0, 0)

    kernel = functools.partial(
        _masked_l1_kernel,
        rows_total=rows, block_rows=br,
        blocks_per_part=blocks_per_part, needs_mask=needs_mask)

    in_bytes = o2.size * o2.dtype.itemsize + t2.size * t2.dtype.itemsize
    cost = pl.CostEstimate(
        flops=6 * o2.size, transcendentals=0,
        bytes_accessed=in_bytes + 2 * num_parts * SUBLANES * LANES * 4)

    compiler_kwargs = dict(dimension_semantics=_parts_axis_semantics(num_parts))
    # Default tiles (4096 rows, f32) need ~8 MiB of double-buffered VMEM and
    # fit every generation's scoped default; only raise the limit when the
    # caller asks for bigger tiles.
    vmem_need = 2 * 2 * br * LANES * max(o2.dtype.itemsize, t2.dtype.itemsize, 4)
    if vmem_need > (12 << 20):
        compiler_kwargs["vmem_limit_bytes"] = min(vmem_need + (8 << 20), 64 << 20)

    psum, pcnt = pl.pallas_call(
        kernel,
        out_shape=(
            jax.ShapeDtypeStruct((num_parts, SUBLANES, LANES), jnp.float32),
            jax.ShapeDtypeStruct((num_parts, SUBLANES, LANES), jnp.float32),
        ),
        grid=(num_parts, blocks_per_part),
        in_specs=[
            pl.BlockSpec((br, LANES), in_map),
            pl.BlockSpec((br, LANES), in_map),
        ],
        out_specs=(
            pl.BlockSpec((None, SUBLANES, LANES), out_map),
            pl.BlockSpec((None, SUBLANES, LANES), out_map),
        ),
        compiler_params=pltpu.CompilerParams(**compiler_kwargs),
        cost_estimate=cost,
    )(o2, t2)

    # Single cross-lane/sublane reduce, once, outside the kernel.
    return jnp.sum(psum), jnp.sum(pcnt)


@functools.partial(jax.jit, static_argnames=("block_rows", "min_pallas_elems"))
def mask_mse_loss(output, target, block_rows=4096, min_pallas_elems=1 << 20):
    """Masked L1 loss: sum(|output-target| over non-NaN targets) / #non-NaN."""
    n = output.size
    o = output.reshape(-1)
    t = target.reshape(-1)

    n_tail = n % LANES
    n_main = n - n_tail
    if n < min_pallas_elems or n_main == 0:
        # Small tensors: a fused XLA reduction beats pallas_call launch +
        # pipeline warm-up overhead.
        s, c = _masked_l1_partial_jnp(o, t)
        return s / c

    tail = None
    if n_tail:
        # Sub-128-element ragged tail: tiny plain-jnp epilogue (no NaN-padding
        # of the full arrays).
        tail = _masked_l1_partial_jnp(o[n_main:], t[n_main:])
        # TODO(synk): this 128-aligned prefix slice still materializes one copy
        # for ragged sizes; a fully copy-free ragged path needs a 1-D /
        # manual-DMA kernel.
        o = o[:n_main]
        t = t[:n_main]

    s, c = _masked_l1_pallas_partial(o.reshape(-1, LANES), t.reshape(-1, LANES),
                                     block_rows)
    if tail is not None:
        s = s + tail[0]
        c = c + tail[1]
    # 0/0 -> NaN if every target is NaN, same as the torch expression.
    return s / c


if __name__ == "__main__":
    key = jax.random.PRNGKey(0)
    k1, k2, k3 = jax.random.split(key, 3)

    def ref_loss(o, t):
        valid = jnp.logical_not(jnp.isnan(t))
        return (jnp.sum(jnp.where(valid, jnp.abs(o - t), 0.0))
                / jnp.sum(valid.astype(jnp.float32)))

    # NCHW, like the torch conv convention.
    shape = (2, 4, 16, 16)
    output = jax.random.normal(k1, shape, dtype=jnp.float32)
    target = jax.random.normal(k2, shape, dtype=jnp.float32)

    # Case 1: NaN-free target, Pallas path forced -> plain mean L1 (== torch).
    loss = jax.block_until_ready(mask_mse_loss(output, target, min_pallas_elems=0))
    ref = jnp.mean(jnp.abs(output - target))
    assert np.allclose(np.asarray(loss), np.asarray(ref), rtol=1e-5, atol=1e-6), (loss, ref)

    # Case 2: target with NaNs -> masked mean L1 over the valid entries.
    nan_mask = jax.random.bernoulli(k3, 0.25, shape)
    target_nan = jnp.where(nan_mask, jnp.nan, target)
    loss_nan = jax.block_until_ready(
        mask_mse_loss(output, target_nan, min_pallas_elems=0))
    ref_nan = ref_loss(output, target_nan)
    assert np.allclose(np.asarray(loss_nan), np.asarray(ref_nan),
                       rtol=1e-5, atol=1e-6), (loss_nan, ref_nan)

    # Case 2b: same inputs through the small-input jnp fast path (defaults).
    loss_fast = jax.block_until_ready(mask_mse_loss(output, target_nan))
    assert np.allclose(np.asarray(loss_fast), np.asarray(ref_nan),
                       rtol=1e-5, atol=1e-6), (loss_fast, ref_nan)

    # Case 3: ragged size (not a multiple of 128) -> Pallas prefix + jnp tail,
    # exercising the in-kernel boundary-row mask (9 valid rows of a 16-row block).
    k4, k5, k6 = jax.random.split(k3, 3)
    rshape = (3, 5, 7, 11)  # 1155 elements
    ro = jax.random.normal(k4, rshape, dtype=jnp.float32)
    rt = jax.random.normal(k5, rshape, dtype=jnp.float32)
    rt = jnp.where(jax.random.bernoulli(k6, 0.1, rshape), jnp.nan, rt)
    rloss = jax.block_until_ready(mask_mse_loss(ro, rt, min_pallas_elems=0))
    rref = ref_loss(ro, rt)
    assert np.allclose(np.asarray(rloss), np.asarray(rref),
                       rtol=1e-5, atol=1e-6), (rloss, rref)

    # Case 4: multi-block + unconditional 2-part split with an odd block count
    # (clamped duplicate block + partial last block), using a small block_rows
    # so the tensor stays small.
    k7, k8, k9 = jax.random.split(k6, 3)
    bshape = (2, 4, 32, 128)  # 32768 elements -> 256 rows of 128
    bo = jax.random.normal(k7, bshape, dtype=jnp.float32)
    bt = jax.random.normal(k8, bshape, dtype=jnp.float32)
    bt = jnp.where(jax.random.bernoulli(k9, 0.2, bshape), jnp.nan, bt)
    bloss = jax.block_until_ready(
        mask_mse_loss(bo, bt, block_rows=40, min_pallas_elems=0))
    bref = ref_loss(bo, bt)
    assert np.allclose(np.asarray(bloss), np.asarray(bref),
                       rtol=1e-5, atol=1e-6), (bloss, bref)

    print("KERNEL_OK")
</pallas_src>

<mosaic_0001>
module attributes {stable_mosaic.version = 11 : i64} {
  func.func @_masked_l1_kernel(%arg0: i32, %arg1: i32, %arg2: memref<16x128xf32, #tpu.memory_space<vmem>>, %arg3: memref<16x128xf32, #tpu.memory_space<vmem>>, %arg4: memref<1x8x128xf32, #tpu.memory_space<vmem>>, %arg5: memref<1x8x128xf32, #tpu.memory_space<vmem>>) attributes {dimension_semantics = [#tpu.dimension_semantics<parallel>, #tpu.dimension_semantics<arbitrary>], iteration_bounds = array<i64: 1, 1>, scalar_prefetch = 0 : i64, scratch_operands = 0 : i64, tpu.core_type = #tpu.core_type<tc>, window_params = [{transform_indices = @transform_0, window_bounds = array<i64: 16, 128>}, {transform_indices = @transform_1, window_bounds = array<i64: 16, 128>}, {transform_indices = @transform_2, window_bounds = array<i64: 1, 8, 128>}, {transform_indices = @transform_3, window_bounds = array<i64: 1, 8, 128>}]} {
    %c0_i32 = arith.constant 0 : i32
    %0 = arith.cmpi eq, %arg1, %c0_i32 : i32
    %1 = arith.extui %0 : i1 to i32
    %c0_i32_0 = arith.constant 0 : i32
    %2 = arith.cmpi ne, %1, %c0_i32_0 : i32
    scf.if %2 {
      %cst_21 = arith.constant 0.000000e+00 : f32
      %30 = vector.broadcast %cst_21 : f32 to vector<8x128xf32>
      %c0_22 = arith.constant 0 : index
      %c0_23 = arith.constant 0 : index
      %c0_24 = arith.constant 0 : index
      %31 = vector.load %arg4[%c0_22, %c0_23, %c0_24] : memref<1x8x128xf32, #tpu.memory_space<vmem>>, vector<1x8x128xf32>
      %32 = vector.shape_cast %31 : vector<1x8x128xf32> to vector<8x128xf32>
      %33 = vector.shape_cast %30 : vector<8x128xf32> to vector<1x8x128xf32>
      tpu.vector_store %arg4[%c0_22, %c0_23, %c0_24], %33 {strides = array<i32>} : memref<1x8x128xf32, #tpu.memory_space<vmem>>, vector<1x8x128xf32>,
      %cst_25 = arith.constant 0.000000e+00 : f32
      %34 = vector.broadcast %cst_25 : f32 to vector<8x128xf32>
      %c0_26 = arith.constant 0 : index
      %c0_27 = arith.constant 0 : index
      %c0_28 = arith.constant 0 : index
      %35 = vector.load %arg5[%c0_26, %c0_27, %c0_28] : memref<1x8x128xf32, #tpu.memory_space<vmem>>, vector<1x8x128xf32>
      %36 = vector.shape_cast %35 : vector<1x8x128xf32> to vector<8x128xf32>
      %37 = vector.shape_cast %34 : vector<8x128xf32> to vector<1x8x128xf32>
      tpu.vector_store %arg5[%c0_26, %c0_27, %c0_28], %37 {strides = array<i32>} : memref<1x8x128xf32, #tpu.memory_space<vmem>>, vector<1x8x128xf32>,
    } else {
    }
    %c0 = arith.constant 0 : index
    %c0_1 = arith.constant 0 : index
    %3 = vector.load %arg2[%c0, %c0_1] : memref<16x128xf32, #tpu.memory_space<vmem>>, vector<16x128xf32>
    %c0_2 = arith.constant 0 : index
    %c0_3 = arith.constant 0 : index
    %4 = vector.load %arg3[%c0_2, %c0_3] : memref<16x128xf32, #tpu.memory_space<vmem>>, vector<16x128xf32>
    %5 = arith.cmpf one, %4, %4 : vector<16x128xf32>
    %cst = arith.constant dense<true> : vector<16x128xi1>
    %6 = arith.xori %5, %cst : vector<16x128xi1>
    %7 = arith.subf %3, %4 : vector<16x128xf32>
    %8 = math.absf %7 : vector<16x128xf32>
    %cst_4 = arith.constant 0.000000e+00 : f32
    %9 = vector.broadcast %cst_4 : f32 to vector<16x128xf32>
    %10 = arith.select %6, %8, %9 : vector<16x128xi1>, vector<16x128xf32>
    %cst_5 = arith.constant 1.000000e+00 : f32
    %cst_6 = arith.constant 0.000000e+00 : f32
    %11 = vector.broadcast %cst_5 : f32 to vector<16x128xf32>
    %12 = vector.broadcast %cst_6 : f32 to vector<16x128xf32>
    %13 = arith.select %6, %11, %12 : vector<16x128xi1>, vector<16x128xf32>
    %c0_7 = arith.constant 0 : index
    %c0_8 = arith.constant 0 : index
    %c0_9 = arith.constant 0 : index
    %14 = vector.load %arg4[%c0_7, %c0_8, %c0_9] : memref<1x8x128xf32, #tpu.memory_space<vmem>>, vector<1x8x128xf32>
    %15 = vector.shape_cast %14 : vector<1x8x128xf32> to vector<8x128xf32>
    %16 = vector.shape_cast %10 : vector<16x128xf32> to vector<2x8x128xf32>
    %cst_10 = arith.constant dense<0.000000e+00> : vector<8x128xf32>
    %17 = vector.multi_reduction <add>, %16, %cst_10 [0] : vector<2x8x128xf32> to vector<8x128xf32>
    %18 = arith.addf %15, %17 : vector<8x128xf32>
    %c0_11 = arith.constant 0 : index
    %c0_12 = arith.constant 0 : index
    %c0_13 = arith.constant 0 : index
    %19 = vector.load %arg4[%c0_11, %c0_12, %c0_13] : memref<1x8x128xf32, #tpu.memory_space<vmem>>, vector<1x8x128xf32>
    %20 = vector.shape_cast %19 : vector<1x8x128xf32> to vector<8x128xf32>
    %21 = vector.shape_cast %18 : vector<8x128xf32> to vector<1x8x128xf32>
    tpu.vector_store %arg4[%c0_11, %c0_12, %c0_13], %21 {strides = array<i32>} : memref<1x8x128xf32, #tpu.memory_space<vmem>>, vector<1x8x128xf32>,
    %c0_14 = arith.constant 0 : index
    %c0_15 = arith.constant 0 : index
    %c0_16 = arith.constant 0 : index
    %22 = vector.load %arg5[%c0_14, %c0_15, %c0_16] : memref<1x8x128xf32, #tpu.memory_space<vmem>>, vector<1x8x128xf32>
    %23 = vector.shape_cast %22 : vector<1x8x128xf32> to vector<8x128xf32>
    %24 = vector.shape_cast %13 : vector<16x128xf32> to vector<2x8x128xf32>
    %cst_17 = arith.constant dense<0.000000e+00> : vector<8x128xf32>
    %25 = vector.multi_reduction <add>, %24, %cst_17 [0] : vector<2x8x128xf32> to vector<8x128xf32>
    %26 = arith.addf %23, %25 : vector<8x128xf32>
    %c0_18 = arith.constant 0 : index
    %c0_19 = arith.constant 0 : index
    %c0_20 = arith.constant 0 : index
    %27 = vector.load %arg5[%c0_18, %c0_19, %c0_20] : memref<1x8x128xf32, #tpu.memory_space<vmem>>, vector<1x8x128xf32>
    %28 = vector.shape_cast %27 : vector<1x8x128xf32> to vector<8x128xf32>
    %29 = vector.shape_cast %26 : vector<8x128xf32> to vector<1x8x128xf32>
    tpu.vector_store %arg5[%c0_18, %c0_19, %c0_20], %29 {strides = array<i32>} : memref<1x8x128xf32, #tpu.memory_space<vmem>>, vector<1x8x128xf32>,
    return
  }
  func.func @transform_0(%arg0: i32, %arg1: i32) -> (i32, i32) {
    %c1_i32 = arith.constant 1 : i32
    %0 = arith.muli %arg0, %c1_i32 : i32
    %1 = arith.addi %0, %arg1 : i32
    %c0_i32 = arith.constant 0 : i32
    %c0_i32_0 = arith.constant 0 : i32
    return %1, %c0_i32 : i32, i32
  }
  func.func @transform_1(%arg0: i32, %arg1: i32) -> (i32, i32) {
    %c1_i32 = arith.constant 1 : i32
    %0 = arith.muli %arg0, %c1_i32 : i32
    %1 = arith.addi %0, %arg1 : i32
    %c0_i32 = arith.constant 0 : i32
    %c0_i32_0 = arith.constant 0 : i32
    return %1, %c0_i32 : i32, i32
  }
  func.func @transform_2(%arg0: i32, %arg1: i32) -> (i32, i32, i32) {
    %c0_i32 = arith.constant 0 : i32
    %c0_i32_0 = arith.constant 0 : i32
    %c0_i32_1 = arith.constant 0 : i32
    return %arg0, %c0_i32, %c0_i32_0 : i32, i32, i32
  }
  func.func @transform_3(%arg0: i32, %arg1: i32) -> (i32, i32, i32) {
    %c0_i32 = arith.constant 0 : i32
    %c0_i32_0 = arith.constant 0 : i32
    %c0_i32_1 = arith.constant 0 : i32
    return %arg0, %c0_i32, %c0_i32_0 : i32, i32, i32
  }
}

</mosaic_0001>

<bundles_post_ra>
// kernel: mask_mse_loss.1
= control target key start
LH: loop header
LB: loop body
LE: loop exit
PB: predicated region body
PF: predicated region fallthrough
CT: control target
= control target key end

     0   :  { %vm109_vm2 = vmmov 1   ;;  %v110_v7 = vmov 0.0   ;;  %s149_s0 = inlined_call_operand.vmem [shape: f32[16,128], index: 0, kind: input, shape index: {}]   ;;  %s150_s1 = inlined_call_operand.vmem [shape: f32[16,128], index: 1, kind: input, shape index: {}]   ;;  %s151_s3 = inlined_call_operand.vmem [shape: f32[1,8,128], index: 3, kind: output, shape index: {1}]   ;;  %s152_s2 = inlined_call_operand.vmem [shape: f32[1,8,128], index: 2, kind: output, shape index: {0}]  }
   0x1   :  { %v63_v0 = vld [vmem:[%s149_s0] sm:$0xff]  ;;  %v64_v1 = vld [vmem:[%s149_s0 + $0x8] sm:$0xff] }
   0x2   :  { %v65_v2 = vld [vmem:[%s150_s1] sm:$0xff]  ;;  %v66_v3 = vld [vmem:[%s150_s1 + $0x8] sm:$0xff] }
   0x3   :  { %vm67_vm0 = vcmp.ne.f32.partialorder %v65_v2, %v65_v2  ;;  %v71_v4 = vsub.f32 %v63_v0, %v65_v2  ;;  %vm68_vm1 = vcmp.ne.f32.partialorder %v66_v3, %v66_v3  ;;  %v72_v5 = vsub.f32 %v64_v1, %v66_v3 }
   0x4   :  { %vm69_vm3 = vmxor %vm67_vm0, %vm109_vm2 }
   0x5   :  { %vm70_vm4 = vmxor %vm68_vm1, %vm109_vm2  ;;  %v73_v6 = vand.u32 2147483647, %v71_v4  ;;  %v77_v8 = vsel %vm69_vm3, 1.0, %v110_v7  ;;  %v74_v9 = vand.u32 2147483647, %v72_v5 }
   0x6   :  { %v78_v10 = vsel %vm70_vm4, 1.0, %v110_v7 }
   0x7   :  { %v75_v11 = vsel %vm69_vm3, %v73_v6, 0.0  ;;  %v84_v12 = vadd.f32 %v78_v10, %v77_v8  ;;  %v76_v13 = vsel %vm70_vm4, %v74_v9, 0.0 }
   0x8   :  { %v80_v14 = vadd.f32 %v76_v13, %v75_v11 }
   0x9   :  { %86 = vst [vmem:[%s151_s3] sm:$0xff] %v84_v12 }
   0xa   :  { %82 = vst [vmem:[%s152_s2] sm:$0xff] %v80_v14 }

</bundles_post_ra>
